<compile_context>
chip_gen: v5e
topology: v5e:2x2
jax: 0.10.0
libtpu: 0.0.40
codegen_flags: <defaults>
</compile_context>

<pallas_src>
import functools

import jax
import jax.numpy as jnp
from jax.experimental import pallas as pl
from jax.experimental.pallas import tpu as pltpu


def _round_up(v, m):
    return (v + m - 1) // m * m


def _default_vmem_limit():
    """Generation-aware scoped-VMEM limit (bytes), with headroom."""
    cap = 64 * 1024 * 1024  # conservative default (v7x physical per TC)
    try:
        cap = int(pltpu.get_tpu_info().vmem_capacity_bytes)
    except Exception:
        pass
    return int(max(32 * 1024 * 1024, min(cap - 16 * 1024 * 1024, 100 * 1024 * 1024)))


def _fit_n_tile(tn, cp, tcr, nr, vmem_limit):
    """Shrink the N tile until the double-buffered working set fits the budget."""
    budget = int(vmem_limit * 0.9)

    def need(t):
        # pass 1: dbl-buffered bf16 x tiles (+ row view when row-blocked),
        #         dbl-buffered bf16 attention rows, f32 accumulator.
        p1 = (2 * cp * t * 2
              + (2 * tcr * t * 2 if nr > 1 else 0)
              + 2 * tcr * cp * 2
              + tcr * cp * 4)
        # pass 2: dbl-buffered bf16 attention, f32 x and out tiles.
        p2 = 2 * cp * cp * 2 + 2 * 2 * cp * t * 4
        return max(p1, p2)

    while tn > 128 and need(tn) > budget:
        tn -= 128
    return max(tn, 128)


def _softmax_rows(energy, c_real):
    """softmax(rowmax(E) - E) over the real C columns, computed as exp(rowmin - E)."""
    cp = energy.shape[-1]
    if c_real < cp:
        # Padded columns of energy are exactly 0 (zero x rows). Mask them from
        # both the rowmin shift (stability when all real energies >> 0) and from
        # p (exp(rowmin) can overflow; inf * 0 in pass 2 would give NaN).
        col = jax.lax.broadcasted_iota(jnp.int32, energy.shape, 1)
        valid = col < c_real
        e_min = jnp.min(jnp.where(valid, energy, jnp.inf), axis=-1, keepdims=True)
        p = jnp.where(valid, jnp.exp(e_min - energy), 0.0)
    else:
        e_min = jnp.min(energy, axis=-1, keepdims=True)
        p = jnp.exp(e_min - energy)
    denom = jnp.sum(p, axis=-1, keepdims=True)
    return p * pl.reciprocal(denom, approx=True)


def _cam_energy_softmax_single(x_ref, attn_ref, acc_ref, *, c_real):
    # x_ref    : VMEM (1, Cp, TN) bf16 tile
    # attn_ref : VMEM (1, Cp, Cp) bf16 attention (written at last N tile)
    # acc_ref  : VMEM (Cp, Cp) f32 accumulator (persists across the N axis)
    j = pl.program_id(1)

    @pl.when(j == 0)
    def _init():
        acc_ref[...] = jnp.zeros_like(acc_ref)

    xt = x_ref[0]
    acc_ref[...] += jax.lax.dot_general(
        xt, xt,
        dimension_numbers=(((1,), (1,)), ((), ())),
        preferred_element_type=jnp.float32,
    )

    @pl.when(j == pl.num_programs(1) - 1)
    def _finalize():
        attn_ref[0] = _softmax_rows(acc_ref[...], c_real).astype(attn_ref.dtype)


def _cam_energy_softmax_rowblocked(xr_ref, xc_ref, attn_ref, acc_ref, *, c_real):
    # xr_ref   : VMEM (1, TCR, TN) bf16 row-block of x
    # xc_ref   : VMEM (1, Cp, TN)  bf16 all channels of x
    # attn_ref : VMEM (1, TCR, Cp) bf16 attention rows (written at last N tile)
    # acc_ref  : VMEM (TCR, Cp) f32 accumulator
    j = pl.program_id(2)

    @pl.when(j == 0)
    def _init():
        acc_ref[...] = jnp.zeros_like(acc_ref)

    acc_ref[...] += jax.lax.dot_general(
        xr_ref[0], xc_ref[0],
        dimension_numbers=(((1,), (1,)), ((), ())),
        preferred_element_type=jnp.float32,
    )

    @pl.when(j == pl.num_programs(2) - 1)
    def _finalize():
        attn_ref[0] = _softmax_rows(acc_ref[...], c_real).astype(attn_ref.dtype)


def _cam_apply_kernel(gamma_ref, attn_ref, x_ref, o_ref):
    # gamma_ref : SMEM (1,) scalar parameter
    # attn_ref  : VMEM (1, Cp, Cp) bf16 attention (block index constant across j)
    # x_ref     : VMEM (1, Cp, TN) f32 input tile (kept f32 for the residual add)
    # o_ref     : VMEM (1, Cp, TN) f32 output tile
    x = x_ref[0]
    out = jnp.dot(attn_ref[0], x.astype(jnp.bfloat16),
                  preferred_element_type=jnp.float32)
    o_ref[0] = (gamma_ref[0] * out + x).astype(o_ref.dtype)


def cam_module_forward(x, gamma, *, n_tile=1024, c_row_tile=1024, vmem_limit_bytes=None):
    """x: (B, C, H, W) float32; gamma: (1,) float32. Returns (B, C, H, W)."""
    B, C, H, W = x.shape
    N = H * W

    # Channel padding: multiple of 128 (lane-dense attention, bf16 sublane packing),
    # further padded so the row blocks tile exactly.
    cp = _round_up(C, 128)
    tcr = min(_round_up(c_row_tile, 128), cp)
    nr = pl.cdiv(cp, tcr)
    cp = nr * tcr

    vmem_limit = int(vmem_limit_bytes) if vmem_limit_bytes is not None else _default_vmem_limit()

    tn = min(_round_up(n_tile, 128), _round_up(N, 128))
    tn = _fit_n_tile(tn, cp, tcr, nr, vmem_limit)
    np_ = _round_up(N, tn)
    nj = np_ // tn

    xf = x.reshape(B, C, N).astype(jnp.float32)
    if (cp, np_) != (C, N):
        xf = jnp.pad(xf, ((0, 0), (0, cp - C), (0, np_ - N)))
    xf16 = xf.astype(jnp.bfloat16)   # bf16 feed for the MXU passes

    # ---- Pass 1: attention = softmax(rowmax(X X^T) - X X^T) -> (B, Cp, Cp) bf16
    if nr == 1:
        attn = pl.pallas_call(
            functools.partial(_cam_energy_softmax_single, c_real=C),
            out_shape=jax.ShapeDtypeStruct((B, cp, cp), jnp.bfloat16),
            grid_spec=pltpu.PrefetchScalarGridSpec(
                num_scalar_prefetch=0,
                grid=(B, nj),
                in_specs=[pl.BlockSpec((1, cp, tn), lambda b, j: (b, 0, j))],
                out_specs=pl.BlockSpec((1, cp, cp), lambda b, j: (b, 0, 0)),
                scratch_shapes=[pltpu.VMEM((cp, cp), jnp.float32)],
            ),
            compiler_params=pltpu.CompilerParams(
                dimension_semantics=("parallel", "arbitrary"),
                vmem_limit_bytes=vmem_limit,
            ),
            cost_estimate=pl.CostEstimate(
                flops=2 * B * cp * cp * np_,
                transcendentals=B * cp * cp,
                bytes_accessed=B * cp * np_ * 2 + B * cp * cp * 2,
            ),
        )(xf16)
    else:
        attn = pl.pallas_call(
            functools.partial(_cam_energy_softmax_rowblocked, c_real=C),
            out_shape=jax.ShapeDtypeStruct((B, cp, cp), jnp.bfloat16),
            grid_spec=pltpu.PrefetchScalarGridSpec(
                num_scalar_prefetch=0,
                grid=(B, nr, nj),
                in_specs=[
                    pl.BlockSpec((1, tcr, tn), lambda b, r, j: (b, r, j)),  # row block
                    pl.BlockSpec((1, cp, tn), lambda b, r, j: (b, 0, j)),   # all channels
                ],
                out_specs=pl.BlockSpec((1, tcr, cp), lambda b, r, j: (b, r, 0)),
                scratch_shapes=[pltpu.VMEM((tcr, cp), jnp.float32)],
            ),
            compiler_params=pltpu.CompilerParams(
                dimension_semantics=("parallel", "parallel", "arbitrary"),
                vmem_limit_bytes=vmem_limit,
            ),
            cost_estimate=pl.CostEstimate(
                flops=2 * B * cp * cp * np_,
                transcendentals=B * cp * cp,
                bytes_accessed=B * (nr + 1) * cp * np_ * 2 + B * cp * cp * 2,
            ),
        )(xf16, xf16)

    # ---- Pass 2: out = gamma * (attention @ X) + X -> (B, Cp, Np) f32
    out_flat = pl.pallas_call(
        _cam_apply_kernel,
        out_shape=jax.ShapeDtypeStruct((B, cp, np_), x.dtype),
        grid_spec=pltpu.PrefetchScalarGridSpec(
            num_scalar_prefetch=0,
            grid=(B, nj),
            in_specs=[
                pl.BlockSpec(memory_space=pltpu.MemorySpace.SMEM),  # gamma scalar
                pl.BlockSpec((1, cp, cp), lambda b, j: (b, 0, 0)),  # attention (bf16)
                pl.BlockSpec((1, cp, tn), lambda b, j: (b, 0, j)),  # x tile (f32)
            ],
            out_specs=pl.BlockSpec((1, cp, tn), lambda b, j: (b, 0, j)),
        ),
        compiler_params=pltpu.CompilerParams(
            dimension_semantics=("parallel", "parallel"),
            vmem_limit_bytes=vmem_limit,
        ),
        cost_estimate=pl.CostEstimate(
            flops=2 * B * cp * cp * np_ + 2 * B * cp * np_,
            transcendentals=0,
            bytes_accessed=2 * B * cp * np_ * 4 + B * cp * cp * 2,
        ),
    )(gamma, attn, xf)

    return out_flat[:, :C, :N].reshape(B, C, H, W)


def cam_module_reference(x, gamma, mxu_dtype=None):
    """Pure-JAX reference mirroring the PyTorch forward.

    If mxu_dtype is given, the matmul operands (and the attention) are quantized
    to that dtype, mirroring the kernel's bf16 MXU feeds; everything else is f32.
    """
    B, C, H, W = x.shape
    pq = x.reshape(B, C, H * W).astype(jnp.float32)           # proj_query (B, C, N)
    pm = pq if mxu_dtype is None else pq.astype(mxu_dtype).astype(jnp.float32)
    energy = jnp.einsum("bcn,bkn->bck", pm, pm)               # (B, C, C)
    energy_new = jnp.max(energy, axis=-1, keepdims=True) - energy
    attention = jax.nn.softmax(energy_new, axis=-1)
    am = attention if mxu_dtype is None else attention.astype(mxu_dtype).astype(jnp.float32)
    out = jnp.einsum("bck,bkn->bcn", am, pm)                  # (B, C, N)
    out = out.reshape(B, C, H, W)
    return gamma[0] * out + x


if __name__ == "__main__":
    key = jax.random.PRNGKey(0)

    # --- Test 1: small shape, gamma=0 (module init) must reproduce the input exactly.
    B, C, H, W = 2, 4, 16, 16
    x = jax.random.normal(key, (B, C, H, W), dtype=jnp.float32)

    gamma0 = jnp.zeros((1,), dtype=jnp.float32)
    out0 = jax.block_until_ready(cam_module_forward(x, gamma0, n_tile=128))
    ref0 = cam_module_reference(x, gamma0)
    assert out0.shape == (B, C, H, W)
    assert jnp.allclose(out0, ref0, atol=1e-5, rtol=1e-5), "mismatch vs reference (gamma=0)"

    # Non-zero gamma exercises the attention path (bf16 MXU feeds, bf16 attention,
    # approx reciprocal); compare against a reference quantized the same way.
    gamma1 = jnp.full((1,), 0.75, dtype=jnp.float32)
    out1 = jax.block_until_ready(cam_module_forward(x, gamma1, n_tile=128))
    ref1 = cam_module_reference(x, gamma1, mxu_dtype=jnp.bfloat16)
    assert jnp.allclose(out1, ref1, atol=2e-2, rtol=2e-2), "mismatch vs reference (gamma!=0)"

    # --- Test 2: force the C-row-blocked pass-1 path (nr > 1) plus padded-C masking.
    key2 = jax.random.PRNGKey(0)
    B2, C2, H2, W2 = 1, 160, 16, 16
    x2 = jax.random.normal(key2, (B2, C2, H2, W2), dtype=jnp.float32) * 0.1
    gamma2 = jnp.full((1,), 0.5, dtype=jnp.float32)
    out2 = jax.block_until_ready(
        cam_module_forward(x2, gamma2, n_tile=128, c_row_tile=128))
    ref2 = cam_module_reference(x2, gamma2, mxu_dtype=jnp.bfloat16)
    assert out2.shape == (B2, C2, H2, W2)
    assert jnp.allclose(out2, ref2, atol=2e-2, rtol=2e-2), "mismatch vs reference (row-blocked)"

    print("KERNEL_OK")
</pallas_src>

<mosaic_0001>
module attributes {stable_mosaic.version = 11 : i64} {
  func.func @_cam_energy_softmax_single(%arg0: i32, %arg1: i32, %arg2: memref<1x128x128xbf16, #tpu.memory_space<vmem>>, %arg3: memref<1x128x128xbf16, #tpu.memory_space<vmem>>, %arg4: memref<128x128xf32, #tpu.memory_space<vmem>>) attributes {dimension_semantics = [#tpu.dimension_semantics<parallel>, #tpu.dimension_semantics<arbitrary>], iteration_bounds = array<i64: 2, 2>, scalar_prefetch = 0 : i64, scratch_operands = 1 : i64, tpu.core_type = #tpu.core_type<tc>, window_params = [{transform_indices = @transform_0, window_bounds = array<i64: 1, 128, 128>}, {transform_indices = @transform_1, window_bounds = array<i64: 1, 128, 128>}]} {
    %c0_i32 = arith.constant 0 : i32
    %0 = arith.cmpi eq, %arg1, %c0_i32 : i32
    %1 = arith.extui %0 : i1 to i32
    %c0_i32_0 = arith.constant 0 : i32
    %2 = arith.cmpi ne, %1, %c0_i32_0 : i32
    scf.if %2 {
      %cst_8 = arith.constant 0.000000e+00 : f32
      %12 = vector.broadcast %cst_8 : f32 to vector<128x128xf32>
      %c0_9 = arith.constant 0 : index
      %c0_10 = arith.constant 0 : index
      %13 = vector.load %arg4[%c0_9, %c0_10] : memref<128x128xf32, #tpu.memory_space<vmem>>, vector<128x128xf32>
      tpu.vector_store %arg4[%c0_9, %c0_10], %12 {strides = array<i32>} : memref<128x128xf32, #tpu.memory_space<vmem>>, vector<128x128xf32>,
    } else {
    }
    %c0 = arith.constant 0 : index
    %c0_1 = arith.constant 0 : index
    %c0_2 = arith.constant 0 : index
    %3 = vector.load %arg2[%c0, %c0_1, %c0_2] : memref<1x128x128xbf16, #tpu.memory_space<vmem>>, vector<1x128x128xbf16>
    %4 = vector.shape_cast %3 : vector<1x128x128xbf16> to vector<128x128xbf16>
    %c0_3 = arith.constant 0 : index
    %c0_4 = arith.constant 0 : index
    %5 = vector.load %arg4[%c0_3, %c0_4] : memref<128x128xf32, #tpu.memory_space<vmem>>, vector<128x128xf32>
    %cst = arith.constant dense<0.000000e+00> : vector<128x128xf32>
    %6 = tpu.matmul %4, %4, %cst {dimension_numbers = #tpu.dot_dimension_numbers<[1], [1], [0], [0], [0, 0, 1, 0], [], []>} : vector<128x128xbf16>, vector<128x128xbf16>, vector<128x128xf32> -> vector<128x128xf32>
    %7 = arith.addf %5, %6 : vector<128x128xf32>
    %c0_5 = arith.constant 0 : index
    %c0_6 = arith.constant 0 : index
    %8 = vector.load %arg4[%c0_5, %c0_6] : memref<128x128xf32, #tpu.memory_space<vmem>>, vector<128x128xf32>
    tpu.vector_store %arg4[%c0_5, %c0_6], %7 {strides = array<i32>} : memref<128x128xf32, #tpu.memory_space<vmem>>, vector<128x128xf32>,
    %c1_i32 = arith.constant 1 : i32
    %9 = arith.cmpi eq, %arg1, %c1_i32 : i32
    %10 = arith.extui %9 : i1 to i32
    %c0_i32_7 = arith.constant 0 : i32
    %11 = arith.cmpi ne, %10, %c0_i32_7 : i32
    scf.if %11 {
      %c0_8 = arith.constant 0 : index
      %c0_9 = arith.constant 0 : index
      %12 = vector.load %arg4[%c0_8, %c0_9] : memref<128x128xf32, #tpu.memory_space<vmem>>, vector<128x128xf32>
      %13 = tpu.iota {dimensions = array<i32: 1>} : vector<128x128xi32>
      %c4_i32 = arith.constant 4 : i32
      %14 = vector.broadcast %c4_i32 : i32 to vector<128x128xi32>
      %15 = arith.cmpi slt, %13, %14 : vector<128x128xi32>
      %cst_10 = arith.constant 0x7F800000 : f32
      %16 = vector.broadcast %cst_10 : f32 to vector<128x128xf32>
      %17 = arith.select %15, %12, %16 : vector<128x128xi1>, vector<128x128xf32>
      %cst_11 = arith.constant dense<0x7F800000> : vector<128xf32>
      %18 = vector.multi_reduction <minimumf>, %17, %cst_11 [1] : vector<128x128xf32> to vector<128xf32>
      %19 = vector.shape_cast %18 : vector<128xf32> to vector<128x1xf32>
      %20 = vector.broadcast %19 : vector<128x1xf32> to vector<128x128xf32>
      %21 = arith.subf %20, %12 : vector<128x128xf32>
      %22 = math.exp %21 : vector<128x128xf32>
      %cst_12 = arith.constant 0.000000e+00 : f32
      %23 = vector.broadcast %cst_12 : f32 to vector<128x128xf32>
      %24 = arith.select %15, %22, %23 : vector<128x128xi1>, vector<128x128xf32>
      %cst_13 = arith.constant dense<0.000000e+00> : vector<128xf32>
      %25 = vector.multi_reduction <add>, %24, %cst_13 [1] : vector<128x128xf32> to vector<128xf32>
      %26 = vector.shape_cast %25 : vector<128xf32> to vector<128x1xf32>
      %27 = tpu.reciprocal %26 {approx = true} : vector<128x1xf32> -> vector<128x1xf32>
      %28 = vector.broadcast %27 : vector<128x1xf32> to vector<128x128xf32>
      %29 = arith.mulf %24, %28 : vector<128x128xf32>
      %30 = arith.truncf %29 : vector<128x128xf32> to vector<128x128xbf16>
      %c0_14 = arith.constant 0 : index
      %c0_15 = arith.constant 0 : index
      %c0_16 = arith.constant 0 : index
      %31 = vector.load %arg3[%c0_14, %c0_15, %c0_16] : memref<1x128x128xbf16, #tpu.memory_space<vmem>>, vector<1x128x128xbf16>
      %32 = vector.shape_cast %31 : vector<1x128x128xbf16> to vector<128x128xbf16>
      %33 = vector.shape_cast %30 : vector<128x128xbf16> to vector<1x128x128xbf16>
      tpu.vector_store %arg3[%c0_14, %c0_15, %c0_16], %33 {strides = array<i32>} : memref<1x128x128xbf16, #tpu.memory_space<vmem>>, vector<1x128x128xbf16>,
    } else {
    }
    return
  }
  func.func @transform_0(%arg0: i32, %arg1: i32) -> (i32, i32, i32) {
    %c0_i32 = arith.constant 0 : i32
    %c0_i32_0 = arith.constant 0 : i32
    return %arg0, %c0_i32, %arg1 : i32, i32, i32
  }
  func.func @transform_1(%arg0: i32, %arg1: i32) -> (i32, i32, i32) {
    %c0_i32 = arith.constant 0 : i32
    %c0_i32_0 = arith.constant 0 : i32
    %c0_i32_1 = arith.constant 0 : i32
    return %arg0, %c0_i32, %c0_i32_0 : i32, i32, i32
  }
}

</mosaic_0001>

<bundles_post_ra>
// kernel: tpu_custom_call.1
= control target key start
LH: loop header
LB: loop body
LE: loop exit
PB: predicated region body
PF: predicated region fallthrough
CT: control target
= control target key end

     0   :  { %6 = vsyncpa [#allocation4], 0  ;;  %s1505_s0 = inlined_call_operand.hbm [shape: bf16[2,128,256], index: 0, kind: input, shape index: {}]   ;;  %s1506_s1 = inlined_call_operand.hbm [shape: bf16[2,128,128], index: 1, kind: output, shape index: {}]  }
   0x1   :  { %8 = vsyncpa [#allocation4 + $0x1], 0 }
   0x2   :  { %9 = vsyncpa [#allocation5], 0 }
   0x3   :  { %11 = vsyncpa [#allocation5 + $0x1], 0  ;;  %s1137_s6 = smov 0   ;;  %s1139_s7 = smov 0  }
   0x4   :  { %s1141_s8 = smov 0   ;;  %s1143_s9 = smov 0  }
   0x5   :  { %s1145_s10 = smov 0   ;;  %s1147_s11 = smov 0  }
   0x6   :  { %s1149_s12 = smov 0   ;;  %s1151_s13 = smov 0  }
   0x7   :  { %s1153_s14 = smov 0   ;;  %s1155_s15 = smov 0  }
   0x8   :  { %s1157_s16 = smov 0  }
   0x9 LB: > { %1510 = sst [smem:[#allocation9_spill]] %s1099_s11  ;;  %s666_s17 = sadd.s32 4294967295, %s1119_s16   ;;  %s1119_s16 = sphi %s1157_s16, %s17_s16   ;;  %s1115_s15 = sphi %s1155_s15, %s1530_s15   ;;  %s1111_s14 = sphi %s1153_s14, %s1529_s14   ;;  %s1107_s13 = sphi %s1151_s13, %s1528_s13   ;;  %s1103_s12 = sphi %s1149_s12, %s1527_s12   ;;  %s1099_s11 = sphi %s1147_s11, %s1519_s11   ;;  %s1095_s10 = sphi %s1145_s10, %s1526_s10   ;;  %s1091_s9 = sphi %s1143_s9, %s1525_s9   ;;  %s1087_s8 = sphi %s1141_s8, %s1524_s8   ;;  %s1083_s7 = sphi %s1139_s7, %s1523_s7   ;;  %s1079_s6 = sphi %s1137_s6, %s1522_s6  }
   0xa   : > { %s667_s18 = sadd.s32 4294967294, %s1119_s16   ;;  %s26_s19 = sadd.s32 1, %s1111_s14 }
   0xb   : > { %s29_s20 = sadd.s32 1, %s1115_s15  ;;  %p27_p0 = scmp.ge.s32.totalorder %s26_s19, 2 }
   0xc   : > { %s38_s21 = sadd.s32 1, %s1099_s11  ;;  %p45_p1 = scmp.ne.s32.totalorder %s1099_s11, %s1095_s10 }
   0xd   : > { %p46_p2 = scmp.eq.s32.totalorder %s1119_s16, 0  ;;  %s1532_s19 = smov (%p27_p0, %s26_s19), 0 }
   0xe   : > { %1511 = sst [smem:[#allocation10_spill]] %s1532_s19  ;;  %s1534_s20 = smov (!%p27_p0, %s29_s20), %s1115_s15 }
   0xf   : > { %s34_s22 = ssub.s32 %s1111_s14, %s1532_s19  ;;  %p1203_p3 = por %p46_p2, %p45_p1 }
  0x10   : > { %p31_p4 = scmp.ge.s32.totalorder %s1534_s20, 2  ;;  %p51_p5 = scmp.ne.s32.totalorder %s1095_s10, %s1091_s9 }
  0x11   : > { %p52_p6 = scmp.eq.s32.totalorder %s666_s17, 0  ;;  %s64_s24 = sadd.s32 1, %s1087_s8 }
  0x12   : > { %s1536_s20 = smov (%p31_p4, %s1534_s20), 0  ;;  %p74_p8 = scmp.ne.s32.totalorder %s1087_s8, %s1083_s7 }
  0x13   : > { %1513 = sst [smem:[#allocation11_spill]] %s1536_s20  ;;  %p1211_p7 = por %p52_p6, %p51_p5 }
  0x14   : > { %s33_s26 = ssub.s32 %s1115_s15, %s1536_s20  ;;  %p75_p9 = scmp.eq.s32.totalorder %s666_s17, 3 }
  0x15   : > { %s35_s27 = sor.u32 %s34_s22, %s33_s26  ;;  %p62_p10 = scmp.eq.s32.totalorder %s33_s26, 0 }
  0x16   : > { %p36_p11 = scmp.eq.s32.totalorder %s35_s27, 0  ;;  %p1219_p12 = por %p75_p9, %p74_p8 }
  0x17   : > { %s1224_s29 = scalar_select %p62_p10, %s1087_s8, %s64_s24  }
  0x18   : > { %s1227_s30 = scalar_select %p36_p11, %s1099_s11, %s38_s21  }
  0x19   : > { %p80_p13 = scmp.ne.s32.totalorder %s1083_s7, %s1079_s6  ;;  %p81_p0 = scmp.eq.s32.totalorder %s667_s18, 3 }
  0x1a   : > { %1516 = sst [smem:[#allocation12_spill]] %s1227_s30  ;;  %p807_p1 = scmp.lt.s32.totalorder %s1119_s16, 4 }
  0x1b   : > { %p1232_p2 = por %p81_p0, %p80_p13  ;;  %s101_s3 = sand.u32 1, %s1099_s11  }
  0x1c   : > { %s670_s4 = sshll.u32 %s101_s3, 6  ;;  %s671_s5 = sshll.u32 %s1115_s15, 5 }
  0x1d   : > { %s109_s9 = sadd.s32 %s1111_s14, %s671_s5  ;;  %s105_s17 = scalar_lea.vmem [#allocation3], %s670_s4 }
  0x1e   : > { %s114_s22 = sshll.u32 %s105_s17, 4  ;;  %s672_s26 = sshll.u32 %s109_s9, 2  ;;  %s115_s22 = int_to_ptr.vmem [resolvable:$true] %s114_s22 }
  0x1f   : > { %s111_s27 = scalar_lea.hbm %s1505_s0, %s672_s26  ;;  %p800_p4 = pnand %p807_p1, %p1203_p3 }
  0x20   : > { %s112_s18 = sshll.u32 %s111_s27, 4  ;;  %s102_s20 = scalar_lea.sflag [#allocation4], %s101_s3  ;;  %s113_s18 = int_to_ptr.hbm [resolvable:$true] %s112_s18 }
  0x21   : > { %s1121_s19 = smov 128   ;;  %s1122_s30 = smov 64  }
  0x22   : > { %s1123_s11 = smov 4   ;;  %p673_p5 = scmp.ge.s32.totalorder %s1119_s16, 1 }
  0x23   : > { %802 = dma.hbm_to_vmem [thread:$0]  (!%p800_p4), %s113_s18, 1024, %s115_s22, %s102_s20, %s1121_s19, %s1122_s30, %s1123_s11  }
  0x24   : > { %p122_p6 = scmp.lt.s32.totalorder %s1119_s16, 5 }
  0x26   : > { %p123_p8 = pnand %p673_p5, %p122_p6 }
  0x27   : > { %s128_s4 = sand.u32 (!%p123_p8), 1, %s1095_s10  }
  0x28   : > { %126 = sbr.rel (%p123_p8) target bundleno = 616 (0x268), region = 24  ;;  %s674_s5 = sshll.u32 (!%p123_p8), %s128_s4, 6 }
  0x29   : > { %s129_s9 = scalar_lea.sflag (!%p123_p8), [#allocation4], %s128_s4  ;;  %s1247_s17 = scalar_lea.vmem (!%p123_p8), [#allocation3], %s674_s5 }
  0x2d   : > { %1070 = dma.done.wait (%p1211_p7), %s129_s9, 1024  }
  0x2e   : > { %1072 = vsyncadd (%p1211_p7), %s129_s9, 4294966272  ;;  %s149_s23 = sand.u32 1, %s1083_s7   ;;  %p676_p3 = scmp.ne.s32.totalorder %s1103_s12, 0 }
  0x2f   : > { %s675_s11 = sshll.u32 %s149_s23, 6 }
  0x30   : > { %s1256_s19 = scalar_lea.vmem [#allocation6], %s675_s11  ;;  %155 = sbr.rel (%p676_p3) target bundleno = 70 (0x46), region = 32 }
  0x35   : > { %v1124_v0 = vmov 0.0  }
  0x36   : > { %156 = vst [vmem:[#allocation2 + $0x30] sm:$0xff] %v1124_v0 }
  0x37   : > { %157 = vst [vmem:[#allocation2] sm:$0xff] %v1124_v0 }
  0x38   : > { %158 = vst [vmem:[#allocation2 + $0x58] sm:$0xff] %v1124_v0 }
  0x39   : > { %159 = vst [vmem:[#allocation2 + $0x18] sm:$0xff] %v1124_v0 }
  0x3a   : > { %160 = vst [vmem:[#allocation2 + $0x50] sm:$0xff] %v1124_v0 }
  0x3b   : > { %161 = vst [vmem:[#allocation2 + $0x68] sm:$0xff] %v1124_v0 }
  0x3c   : > { %162 = vst [vmem:[#allocation2 + $0x8] sm:$0xff] %v1124_v0 }
  0x3d   : > { %163 = vst [vmem:[#allocation2 + $0x48] sm:$0xff] %v1124_v0 }
  0x3e   : > { %164 = vst [vmem:[#allocation2 + $0x40] sm:$0xff] %v1124_v0 }
  0x3f   : > { %165 = vst [vmem:[#allocation2 + $0x20] sm:$0xff] %v1124_v0 }
  0x40   : > { %166 = vst [vmem:[#allocation2 + $0x10] sm:$0xff] %v1124_v0 }
  0x41   : > { %167 = vst [vmem:[#allocation2 + $0x38] sm:$0xff] %v1124_v0 }
  0x42   : > { %168 = vst [vmem:[#allocation2 + $0x60] sm:$0xff] %v1124_v0 }
  0x43   : > { %169 = vst [vmem:[#allocation2 + $0x70] sm:$0xff] %v1124_v0 }
  0x44   : > { %170 = vst [vmem:[#allocation2 + $0x78] sm:$0xff] %v1124_v0 }
  0x45   : > { %171 = vst [vmem:[#allocation2 + $0x28] sm:$0xff] %v1124_v0 }
  0x46 PF: > { %v722_v1 = vld [vmem:[%s1247_s17 + $0x38] sm:$0xff]  ;;  %v721_v2 = vld [vmem:[%s1247_s17 + $0x30] sm:$0xff]  ;;  %v720_v3 = vld [vmem:[%s1247_s17 + $0x28] sm:$0xff]  ;;  %p709_p7 = scmp.ne.s32.totalorder %s1103_s12, 1 }
  0x47   : > { %252 = vmatpush.bf16.xpose.msra.mxu0 %v722_v1  ;;  %771 = vmatpush.bf16.xpose.msra.mxu1 %v722_v1  ;;  %v719_v4 = vld [vmem:[%s1247_s17 + $0x20] sm:$0xff]  ;;  %v718_v5 = vld [vmem:[%s1247_s17 + $0x18] sm:$0xff]  ;;  %v717_v6 = vld [vmem:[%s1247_s17 + $0x10] sm:$0xff] }
  0x48   : > { %772 = vmatpush.bf16.xpose.msra.mxu2 %v722_v1  ;;  %773 = vmatpush.bf16.xpose.msra.mxu3 %v722_v1  ;;  %v716_v7 = vld [vmem:[%s1247_s17 + $0x8] sm:$0xff]  ;;  %v715_v8 = vld [vmem:[%s1247_s17] sm:$0xff]  ;;  %v188_v9 = vld [vmem:[#allocation2 + $0x30] sm:$0xff] }
  0x49   : > { %v192_v10 = vld [vmem:[#allocation2 + $0x50] sm:$0xff]  ;;  %v196_v15 = vld [vmem:[#allocation2 + $0x40] sm:$0xff]  ;;  %v193_v18 = vld [vmem:[#allocation2 + $0x68] sm:$0xff] }
  0x4a   : > { %v200_v16 = vld [vmem:[#allocation2 + $0x60] sm:$0xff]  ;;  %v201_v28 = vld [vmem:[#allocation2 + $0x70] sm:$0xff]  ;;  %v190_v29 = vld [vmem:[#allocation2 + $0x58] sm:$0xff] }
  0x4b   : > { %v189_v17 = vld [vmem:[#allocation2] sm:$0xff]  ;;  %v194_v30 = vld [vmem:[#allocation2 + $0x8] sm:$0xff]  ;;  %v198_v39 = vld [vmem:[#allocation2 + $0x10] sm:$0xff] }
  0x4c   : > { %v197_v27 = vld [vmem:[#allocation2 + $0x20] sm:$0xff]  ;;  %v202_v40 = vld [vmem:[#allocation2 + $0x78] sm:$0xff]  ;;  %v195_v42 = vld [vmem:[#allocation2 + $0x48] sm:$0xff] }
  0x4d   : > { %v191_v41 = vld [vmem:[#allocation2 + $0x18] sm:$0xff]  ;;  %v203_v52 = vld [vmem:[#allocation2 + $0x28] sm:$0xff] }
  0x4e   : > { %v199_v51 = vld [vmem:[#allocation2 + $0x38] sm:$0xff] }
  0x4f   : > { %253 = vmatpush.bf16.xpose.msra.mxu0 %v721_v2  ;;  %774 = vmatpush.bf16.xpose.msra.mxu1 %v721_v2 }
  0x50   : > { %775 = vmatpush.bf16.xpose.msra.mxu2 %v721_v2  ;;  %776 = vmatpush.bf16.xpose.msra.mxu3 %v721_v2 }
  0x57   : > { %254 = vmatpush.bf16.xpose.msra.mxu0 %v720_v3  ;;  %777 = vmatpush.bf16.xpose.msra.mxu1 %v720_v3 }
  0x58   : > { %778 = vmatpush.bf16.xpose.msra.mxu2 %v720_v3  ;;  %779 = vmatpush.bf16.xpose.msra.mxu3 %v720_v3 }
  0x5f   : > { %255 = vmatpush.bf16.xpose.msra.mxu0 %v719_v4  ;;  %780 = vmatpush.bf16.xpose.msra.mxu1 %v719_v4 }
  0x60   : > { %781 = vmatpush.bf16.xpose.msra.mxu2 %v719_v4  ;;  %782 = vmatpush.bf16.xpose.msra.mxu3 %v719_v4 }
  0x67   : > { %256 = vmatpush.bf16.xpose.msra.mxu0 %v718_v5  ;;  %783 = vmatpush.bf16.xpose.msra.mxu1 %v718_v5 }
  0x68   : > { %784 = vmatpush.bf16.xpose.msra.mxu2 %v718_v5  ;;  %785 = vmatpush.bf16.xpose.msra.mxu3 %v718_v5 }
  0x6f   : > { %257 = vmatpush.bf16.xpose.msra.mxu0 %v717_v6  ;;  %786 = vmatpush.bf16.xpose.msra.mxu1 %v717_v6 }
  0x70   : > { %787 = vmatpush.bf16.xpose.msra.mxu2 %v717_v6  ;;  %788 = vmatpush.bf16.xpose.msra.mxu3 %v717_v6 }
  0x77   : > { %258 = vmatpush.bf16.xpose.msra.mxu0 %v716_v7  ;;  %789 = vmatpush.bf16.xpose.msra.mxu1 %v716_v7 }
  0x78   : > { %790 = vmatpush.bf16.xpose.msra.mxu2 %v716_v7  ;;  %791 = vmatpush.bf16.xpose.msra.mxu3 %v716_v7 }
  0x7f   : > { %259 = vmatpush.bf16.xpose.msra.mxu0 %v715_v8  ;;  %792 = vmatpush.bf16.xpose.msra.mxu1 %v715_v8 }
  0x80   : > { %793 = vmatpush.bf16.xpose.msra.mxu2 %v715_v8  ;;  %794 = vmatpush.bf16.xpose.msra.mxu3 %v715_v8 }
  0x86   : > { %260 = vmatmul.bf16.vlgmr.msra.gmra.mxu0 %v715_v8  ;;  %270 = vmatmul.bf16.vlgmr.msra.gmra.mxu1 %v717_v6 }
  0x87   : > { %280 = vmatmul.bf16.vlgmr.msra.gmra.mxu2 %v719_v4  ;;  %290 = vmatmul.bf16.vlgmr.msra.gmra.mxu3 %v721_v2 }
  0x96   : > { %265 = vmatmul.bf16.gmra.mxu0 %v716_v7  ;;  %275 = vmatmul.bf16.gmra.mxu1 %v718_v5 }
  0x97   : > { %285 = vmatmul.bf16.gmra.mxu2 %v720_v3  ;;  %295 = vmatmul.bf16.gmra.mxu3 %v722_v1 }
 0x103   : > { %v261_v11 = vpop.f32.mrf.mxu0  ;;  %v271_v12 = vpop.f32.mrf.mxu1 }
 0x104   : > { %v301_v13 = vadd.f32 %v261_v11, %v188_v9  ;;  %v305_v14 = vadd.f32 %v271_v12, %v192_v10 }
 0x106   : > { %317 = vst [vmem:[#allocation2 + $0x30] sm:$0xff] %v301_v13 }
 0x107   : > { %321 = vst [vmem:[#allocation2 + $0x50] sm:$0xff] %v305_v14 }
 0x10a   : > { %v281_v19 = vpop.f32.mrf.mxu2  ;;  %v291_v20 = vpop.f32.mrf.mxu3 }
 0x10b   : > { %v309_v21 = vadd.f32 %v281_v19, %v196_v15  ;;  %v313_v22 = vadd.f32 %v291_v20, %v200_v16  ;;  %v263_v23 = vpop.f32.mrf.mxu0  ;;  %v273_v24 = vpop.f32.mrf.mxu1 }
 0x10c   : > { %v302_v25 = vadd.f32 %v263_v23, %v189_v17  ;;  %v306_v26 = vadd.f32 %v273_v24, %v193_v18 }
 0x10d   : > { %325 = vst [vmem:[#allocation2 + $0x40] sm:$0xff] %v309_v21 }
 0x10e   : > { %329 = vst [vmem:[#allocation2 + $0x60] sm:$0xff] %v313_v22 }
 0x10f   : > { %318 = vst [vmem:[#allocation2] sm:$0xff] %v302_v25 }
 0x110   : > { %322 = vst [vmem:[#allocation2 + $0x68] sm:$0xff] %v306_v26 }
 0x112   : > { %v283_v31 = vpop.f32.mrf.mxu2  ;;  %v293_v32 = vpop.f32.mrf.mxu3 }
 0x113   : > { %v310_v33 = vadd.f32 %v283_v31, %v197_v27  ;;  %v314_v34 = vadd.f32 %v293_v32, %v201_v28  ;;  %v266_v35 = vpop.f32.mrf.mxu0  ;;  %v276_v36 = vpop.f32.mrf.mxu1 }
 0x114   : > { %v303_v37 = vadd.f32 %v266_v35, %v190_v29  ;;  %v307_v38 = vadd.f32 %v276_v36, %v194_v30 }
 0x115   : > { %326 = vst [vmem:[#allocation2 + $0x20] sm:$0xff] %v310_v33 }
 0x116   : > { %330 = vst [vmem:[#allocation2 + $0x70] sm:$0xff] %v314_v34 }
 0x117   : > { %319 = vst [vmem:[#allocation2 + $0x58] sm:$0xff] %v303_v37 }
 0x118   : > { %323 = vst [vmem:[#allocation2 + $0x8] sm:$0xff] %v307_v38 }
 0x11a   : > { %v286_v43 = vpop.f32.mrf.mxu2  ;;  %v296_v44 = vpop.f32.mrf.mxu3 }
 0x11b   : > { %v311_v45 = vadd.f32 %v286_v43, %v198_v39  ;;  %v315_v46 = vadd.f32 %v296_v44, %v202_v40  ;;  %v268_v47 = vpop.f32.mrf.mxu0  ;;  %v278_v48 = vpop.f32.mrf.mxu1 }
 0x11c   : > { %v304_v49 = vadd.f32 %v268_v47, %v191_v41  ;;  %v308_v50 = vadd.f32 %v278_v48, %v195_v42 }
 0x11d   : > { %327 = vst [vmem:[#allocation2 + $0x10] sm:$0xff] %v311_v45 }
 0x11e   : > { %331 = vst [vmem:[#allocation2 + $0x78] sm:$0xff] %v315_v46 }
 0x11f   : > { %320 = vst [vmem:[#allocation2 + $0x18] sm:$0xff] %v304_v49 }
 0x120   : > { %324 = vst [vmem:[#allocation2 + $0x48] sm:$0xff] %v308_v50 }
 0x122   : > { %v288_v53 = vpop.f32.mrf.mxu2  ;;  %v298_v54 = vpop.f32.mrf.mxu3  ;;  %336 = sbr.rel (%p709_p7) target bundleno = 600 (0x258), region = 36 }
 0x123   : > { %v312_v55 = vadd.f32 %v288_v53, %v199_v51  ;;  %v316_v56 = vadd.f32 %v298_v54, %v203_v52 }
 0x125   : > { %328 = vst [vmem:[#allocation2 + $0x38] sm:$0xff] %v312_v55 }
 0x126   : > { %332 = vst [vmem:[#allocation2 + $0x28] sm:$0xff] %v316_v56 }
 0x127   : > { %v353_v57 = vlaneseq  ;;  %v1268_v58 = vld [vmem:[#allocation2 + $0x50] sm:$0xff]  ;;  %v339_v60 = vld [vmem:[#allocation2 + $0x58] sm:$0xff]  ;;  %v342_v1 = vld [vmem:[#allocation2 + $0x68] sm:$0xff] }
 0x128   : > { %v337_v61 = vld [vmem:[#allocation2 + $0x30] sm:$0xff]  ;;  %v340_v2 = vld [vmem:[#allocation2 + $0x18] sm:$0xff]  ;;  %v338_v3 = vld [vmem:[#allocation2] sm:$0xff] }
 0x129   : > { %v1270_v59 = vand.u32 127, %v353_v57  ;;  %v1286_v7 = vld [vmem:[#allocation2 + $0x40] sm:$0xff]  ;;  %v1288_v8 = vld [vmem:[#allocation2 + $0x48] sm:$0xff]  ;;  %v1303_v14 = vld [vmem:[#allocation2 + $0x10] sm:$0xff] }
 0x12a   : > { %v1290_v9 = vld [vmem:[#allocation2 + $0x8] sm:$0xff]  ;;  %v1305_v15 = vld [vmem:[#allocation2 + $0x20] sm:$0xff]  ;;  %v1316_v19 = vld [vmem:[#allocation2 + $0x78] sm:$0xff] }
 0x12b   : > { %vm355_vm0 = vcmp.lt.s32.totalorder %v1270_v59, 4  ;;  %v1318_v20 = vld [vmem:[#allocation2 + $0x70] sm:$0xff]  ;;  %v1320_v21 = vld [vmem:[#allocation2 + $0x60] sm:$0xff] }
 0x12c   : > { %v360_v62 = vsel %vm355_vm0, %v1268_v58, inf  ;;  %v358_v63 = vsel %vm355_vm0, %v339_v60, inf  ;;  %v356_v0 = vsel %vm355_vm0, %v337_v61, inf  ;;  %v361_v4 = vsel %vm355_vm0, %v342_v1, inf  ;;  %v1301_v13 = vld [vmem:[#allocation2 + $0x38] sm:$0xff] }
 0x12d   : > { %380 = vmin.xlane.f32.xlu2 %v360_v62  ;;  %376 = vmin.xlane.f32.xlu1 %v358_v63  ;;  %v359_v5 = vsel %vm355_vm0, %v340_v2, inf  ;;  %v357_v6 = vsel %vm355_vm0, %v338_v3, inf  ;;  %v364_v10 = vsel %vm355_vm0, %v1286_v7, inf  ;;  %v363_v11 = vsel %vm355_vm0, %v1288_v8, inf  ;;  %v1331_v25 = vld [vmem:[#allocation2 + $0x28] sm:$0xff] }
 0x12e   : > { %372 = vmin.xlane.f32.xlu0 %v356_v0  ;;  %v362_v12 = vsel %vm355_vm0, %v1290_v9, inf  ;;  %v367_v16 = vsel %vm355_vm0, %v1301_v13, inf  ;;  %v366_v17 = vsel %vm355_vm0, %v1303_v14, inf  ;;  %v365_v18 = vsel %vm355_vm0, %v1305_v15, inf }
 0x12f   : > { %v370_v22 = vsel %vm355_vm0, %v1316_v19, inf  ;;  %v369_v23 = vsel %vm355_vm0, %v1318_v20, inf  ;;  %v368_v24 = vsel %vm355_vm0, %v1320_v21, inf  ;;  %v371_v26 = vsel %vm355_vm0, %v1331_v25, inf }
 0x135   : > { %382 = vmin.xlane.f32.xlu2 %v361_v4  ;;  %378 = vmin.xlane.f32.xlu1 %v359_v5 }
 0x136   : > { %374 = vmin.xlane.f32.xlu0 %v357_v6 }
 0x13d   : > { %388 = vmin.xlane.f32.xlu2 %v364_v10  ;;  %386 = vmin.xlane.f32.xlu1 %v363_v11 }
 0x13e   : > { %384 = vmin.xlane.f32.xlu0 %v362_v12 }
 0x145   : > { %394 = vmin.xlane.f32.xlu2 %v367_v16  ;;  %392 = vmin.xlane.f32.xlu1 %v366_v17 }
 0x146   : > { %390 = vmin.xlane.f32.xlu0 %v365_v18 }
 0x14d   : > { %400 = vmin.xlane.f32.xlu2 %v370_v22  ;;  %398 = vmin.xlane.f32.xlu1 %v369_v23 }
 0x14e   : > { %396 = vmin.xlane.f32.xlu0 %v368_v24 }
 0x156   : > { %402 = vmin.xlane.f32.xlu0 %v371_v26 }
 0x1a0   : > { %v381_v27 = vpop.xlane.xlu2 %380  ;;  %v377_v28 = vpop.xlane.xlu1 %376 }
 0x1a1   : > { %v406_v29 = vsub.f32 %v377_v28, %v339_v60  ;;  %v373_v30 = vpop.xlane.xlu0 %372  ;;  %v408_v43 = vsub.f32 %v381_v27, %v1268_v58 }
 0x1a2   : > { %v404_v31 = vsub.f32 %v373_v30, %v337_v61 }
 0x1a3   : > { %v424_v32 = vmul.f32 1.442695, %v406_v29  ;;  %v428_v48 = vmul.f32 1.442695, %v408_v43 }
 0x1a4   : > { %v420_v33 = vmul.f32 1.442695, %v404_v31 }
 0x1a5   : > { %903 = vpow2.f32 %v424_v32 }
 0x1a6   : > { %905 = vpow2.f32 %v420_v33 }
 0x1a8   : > { %v383_v34 = vpop.xlane.xlu2 %382  ;;  %v379_v35 = vpop.xlane.xlu1 %378 }
 0x1a9   : > { %v409_v36 = vsub.f32 %v383_v34, %v342_v1  ;;  %v407_v37 = vsub.f32 %v379_v35, %v340_v2  ;;  %v375_v38 = vpop.xlane.xlu0 %374 }
 0x1aa   : > { %v405_v39 = vsub.f32 %v375_v38, %v338_v3 }
 0x1ab   : > { %v430_v40 = vmul.f32 1.442695, %v409_v36  ;;  %v426_v41 = vmul.f32 1.442695, %v407_v37  ;;  %v904_v42 = vpop.eup %903 }
 0x1ac   : > { %v422_v44 = vmul.f32 1.442695, %v405_v39  ;;  %v906_v45 = vpop.eup %905  ;;  %v1339_v46 = vsel %vm355_vm0, %v904_v42, 0.0 }
 0x1ad   : > { %907 = vpow2.f32 %v430_v40  ;;  %472 = vadd.xlane.f32.xlu0 %v1339_v46  ;;  %v1344_v47 = vsel %vm355_vm0, %v906_v45, 0.0 }
 0x1ae   : > { %909 = vpow2.f32 %v426_v41  ;;  %468 = vadd.xlane.f32.xlu1 %v1344_v47 }
 0x1af   : > { %911 = vpow2.f32 %v422_v44 }
 0x1b0   : > { %v389_v49 = vpop.xlane.xlu2 %388  ;;  %v387_v50 = vpop.xlane.xlu1 %386  ;;  %913 = vpow2.f32 %v428_v48 }
 0x1b1   : > { %v412_v51 = vsub.f32 %v389_v49, %v1286_v7  ;;  %v385_v52 = vpop.xlane.xlu0 %384  ;;  %v411_v56 = vsub.f32 %v387_v50, %v1288_v8 }
 0x1b2   : > { %v410_v53 = vsub.f32 %v385_v52, %v1290_v9 }
 0x1b3   : > { %v908_v54 = vpop.eup %907  ;;  %v436_v55 = vmul.f32 1.442695, %v412_v51  ;;  %v434_v0 = vmul.f32 1.442695, %v411_v56 }
 0x1b4   : > { %v910_v57 = vpop.eup %909  ;;  %v432_v58 = vmul.f32 1.442695, %v410_v53  ;;  %v1352_v60 = vsel %vm355_vm0, %v908_v54, 0.0 }
 0x1b5   : > { %v912_v61 = vpop.eup %911  ;;  %915 = vpow2.f32 %v436_v55  ;;  %v1356_v62 = vsel %vm355_vm0, %v910_v57, 0.0  ;;  %478 = vadd.xlane.f32.xlu0 %v1352_v60 }
 0x1b6   : > { %917 = vpow2.f32 %v432_v58  ;;  %v1361_v63 = vsel %vm355_vm0, %v912_v61, 0.0  ;;  %474 = vadd.xlane.f32.xlu1 %v1356_v62  ;;  %v914_v5 = vpop.eup %913 }
 0x1b7   : > { %470 = vadd.xlane.f32.xlu2 %v1361_v63  ;;  %919 = vpow2.f32 %v434_v0 }
 0x1b8   : > { %v395_v1 = vpop.xlane.xlu2 %394  ;;  %v393_v2 = vpop.xlane.xlu1 %392 }
 0x1b9   : > { %v415_v3 = vsub.f32 %v395_v1, %v1301_v13  ;;  %v391_v4 = vpop.xlane.xlu0 %390  ;;  %v414_v9 = vsub.f32 %v393_v2, %v1303_v14  ;;  %v1379_v13 = vsel %vm355_vm0, %v914_v5, 0.0 }
 0x1ba   : > { %v413_v6 = vsub.f32 %v391_v4, %v1305_v15 }
 0x1bb   : > { %v916_v7 = vpop.eup %915  ;;  %v442_v8 = vmul.f32 1.442695, %v415_v3  ;;  %v440_v14 = vmul.f32 1.442695, %v414_v9 }
 0x1bc   : > { %v918_v10 = vpop.eup %917  ;;  %v438_v11 = vmul.f32 1.442695, %v413_v6  ;;  %v1370_v12 = vsel %vm355_vm0, %v916_v7, 0.0 }
 0x1bd   : > { %921 = vpow2.f32 %v442_v8  ;;  %v1374_v16 = vsel %vm355_vm0, %v918_v10, 0.0  ;;  %484 = vadd.xlane.f32.xlu0 %v1370_v12  ;;  %v920_v18 = vpop.eup %919 }
 0x1be   : > { %923 = vpow2.f32 %v438_v11  ;;  %480 = vadd.xlane.f32.xlu1 %v1374_v16  ;;  %v1392_v32 = vsel %vm355_vm0, %v920_v18, 0.0 }
 0x1bf   : > { %476 = vadd.xlane.f32.xlu2 %v1379_v13  ;;  %925 = vpow2.f32 %v440_v14 }
 0x1c0   : > { %v401_v15 = vpop.xlane.xlu2 %400  ;;  %v399_v17 = vpop.xlane.xlu1 %398 }
 0x1c1   : > { %v418_v22 = vsub.f32 %v401_v15, %v1316_v19  ;;  %v397_v23 = vpop.xlane.xlu0 %396  ;;  %v417_v28 = vsub.f32 %v399_v17, %v1318_v20 }
 0x1c2   : > { %v416_v24 = vsub.f32 %v397_v23, %v1320_v21 }
 0x1c3   : > { %v922_v26 = vpop.eup %921  ;;  %v448_v27 = vmul.f32 1.442695, %v418_v22  ;;  %v446_v20 = vmul.f32 1.442695, %v417_v28 }
 0x1c4   : > { %v924_v29 = vpop.eup %923  ;;  %v444_v30 = vmul.f32 1.442695, %v416_v24  ;;  %v1388_v31 = vsel %vm355_vm0, %v922_v26, 0.0 }
 0x1c5   : > { %927 = vpow2.f32 %v448_v27  ;;  %v1396_v19 = vsel %vm355_vm0, %v924_v29, 0.0  ;;  %490 = vadd.xlane.f32.xlu0 %v1388_v31  ;;  %v926_v21 = vpop.eup %925 }
 0x1c6   : > { %929 = vpow2.f32 %v444_v30  ;;  %486 = vadd.xlane.f32.xlu1 %v1396_v19  ;;  %v1408_v39 = vsel %vm355_vm0, %v926_v21, 0.0 }
 0x1c7   : > { %482 = vadd.xlane.f32.xlu2 %v1392_v32  ;;  %931 = vpow2.f32 %v446_v20 }
 0x1c9   : > { %v403_v33 = vpop.xlane.xlu0 %402 }
 0x1ca   : > { %v419_v34 = vsub.f32 %v403_v33, %v1331_v25 }
 0x1cb   : > { %v928_v35 = vpop.eup %927 }
 0x1cc   : > { %v930_v36 = vpop.eup %929  ;;  %v450_v37 = vmul.f32 1.442695, %v419_v34  ;;  %v1404_v38 = vsel %vm355_vm0, %v928_v35, 0.0 }
 0x1cd   : > { %v1412_v40 = vsel %vm355_vm0, %v930_v36, 0.0  ;;  %496 = vadd.xlane.f32.xlu0 %v1404_v38  ;;  %v932_v25 = vpop.eup %931 }
 0x1ce   : > { %933 = vpow2.f32 %v450_v37  ;;  %492 = vadd.xlane.f32.xlu1 %v1412_v40  ;;  %v1419_v42 = vsel %vm355_vm0, %v932_v25, 0.0 }
 0x1cf   : > { %488 = vadd.xlane.f32.xlu2 %v1408_v39 }
 0x1d4   : > { %v934_v41 = vpop.eup %933 }
 0x1d5   : > { %v1423_v43 = vsel %vm355_vm0, %v934_v41, 0.0 }
 0x1d6   : > { %498 = vadd.xlane.f32.xlu1 %v1423_v43 }
 0x1d7   : > { %494 = vadd.xlane.f32.xlu2 %v1419_v42 }
 0x220   : > { %v473_v44 = vpop.xlane.xlu0 %472 }
 0x221   : > { %v469_v45 = vpop.xlane.xlu1 %468  ;;  %935 = vrcp.f32 %v473_v44 }
 0x222   : > { %937 = vrcp.f32 %v469_v45 }
 0x227   : > { %v936_v51 = vpop.eup %935 }
 0x228   : > { %v479_v48 = vpop.xlane.xlu0 %478  ;;  %v938_v52 = vpop.eup %937  ;;  %v518_v54 = vmul.f32 %v936_v51, %v1339_v46 }
 0x229   : > { %v475_v49 = vpop.xlane.xlu1 %474  ;;  %v516_v58 = vmul.f32 %v938_v52, %v1344_v47 }
 0x22a   : > { %v471_v50 = vpop.xlane.xlu2 %470  ;;  %939 = vrcp.f32 %v475_v49 }
 0x22b   : > { %941 = vrcp.f32 %v471_v50 }
 0x22c   : > { %943 = vrcp.f32 %v479_v48 }
 0x230   : > { %v940_v59 = vpop.eup %939  ;;  %v485_v0 = vpop.xlane.xlu0 %484 }
 0x231   : > { %v942_v53 = vpop.eup %941  ;;  %v519_v55 = vmul.f32 %v940_v59, %v1356_v62  ;;  %v481_v57 = vpop.xlane.xlu1 %480 }
 0x232   : > { %v477_v56 = vpop.xlane.xlu2 %476  ;;  %v517_v61 = vmul.f32 %v942_v53, %v1361_v63  ;;  %v944_v3 = vpop.eup %943 }
 0x233   : > { %945 = vrcp.f32 %v477_v56  ;;  %v732_v1 = vpack.c.bf16 %v519_v55, %v518_v54  ;;  %v521_v46 = vmul.f32 %v944_v3, %v1352_v60 }
 0x234   : > { %v727_v2 = vpack.c.bf16 %v517_v61, %v516_v58  ;;  %947 = vrcp.f32 %v481_v57 }
 0x235   : > { %764 = vst [vmem:[%s1256_s19 + $0x8] sm:$0xff] %v732_v1   ;;  %949 = vrcp.f32 %v485_v0 }
 0x236   : > { %728 = vst [vmem:[%s1256_s19] sm:$0xff] %v727_v2  }
 0x238   : > { %v491_v63 = vpop.xlane.xlu0 %490 }
 0x239   : > { %v946_v4 = vpop.eup %945  ;;  %v487_v6 = vpop.xlane.xlu1 %486 }
 0x23a   : > { %v520_v62 = vmul.f32 %v946_v4, %v1379_v13  ;;  %v483_v5 = vpop.xlane.xlu2 %482  ;;  %v948_v7 = vpop.eup %947 }
 0x23b   : > { %951 = vrcp.f32 %v483_v5  ;;  %v950_v8 = vpop.eup %949  ;;  %v522_v11 = vmul.f32 %v948_v7, %v1374_v16 }
 0x23c   : > { %v737_v47 = vpack.c.bf16 %v521_v46, %v520_v62  ;;  %953 = vrcp.f32 %v487_v6  ;;  %v524_v15 = vmul.f32 %v950_v8, %v1370_v12 }
 0x23d   : > { %955 = vrcp.f32 %v491_v63 }
 0x23e   : > { %765 = vst [vmem:[%s1256_s19 + $0x10] sm:$0xff] %v737_v47  }
 0x240   : > { %v497_v24 = vpop.xlane.xlu0 %496 }
 0x241   : > { %v952_v9 = vpop.eup %951  ;;  %v493_v14 = vpop.xlane.xlu1 %492 }
 0x242   : > { %v954_v10 = vpop.eup %953  ;;  %v523_v60 = vmul.f32 %v952_v9, %v1392_v32  ;;  %v489_v13 = vpop.xlane.xlu2 %488 }
 0x243   : > { %v525_v17 = vmul.f32 %v954_v10, %v1396_v19  ;;  %957 = vrcp.f32 %v489_v13  ;;  %v956_v23 = vpop.eup %955 }
 0x244   : > { %v742_v18 = vpack.c.bf16 %v523_v60, %v522_v11  ;;  %959 = vrcp.f32 %v493_v14  ;;  %v527_v16 = vmul.f32 %v956_v23, %v1388_v31 }
 0x245   : > { %v747_v22 = vpack.c.bf16 %v525_v17, %v524_v15  ;;  %961 = vrcp.f32 %v497_v24 }
 0x246   : > { %766 = vst [vmem:[%s1256_s19 + $0x18] sm:$0xff] %v742_v18  }
 0x247   : > { %767 = vst [vmem:[%s1256_s19 + $0x20] sm:$0xff] %v747_v22  }
 0x249   : > { %v958_v26 = vpop.eup %957  ;;  %v499_v12 = vpop.xlane.xlu1 %498 }
 0x24a   : > { %v526_v27 = vmul.f32 %v958_v26, %v1408_v39  ;;  %v495_v28 = vpop.xlane.xlu2 %494  ;;  %v960_v30 = vpop.eup %959 }
 0x24b   : > { %963 = vrcp.f32 %v495_v28  ;;  %v962_v32 = vpop.eup %961  ;;  %v528_v21 = vmul.f32 %v960_v30, %v1412_v40 }
 0x24c   : > { %v752_v29 = vpack.c.bf16 %v527_v16, %v526_v27  ;;  %965 = vrcp.f32 %v499_v12  ;;  %v530_v31 = vmul.f32 %v962_v32, %v1404_v38 }
 0x24e   : > { %768 = vst [vmem:[%s1256_s19 + $0x28] sm:$0xff] %v752_v29  }
 0x251   : > { %v964_v19 = vpop.eup %963 }
 0x252   : > { %v966_v20 = vpop.eup %965  ;;  %v529_v33 = vmul.f32 %v964_v19, %v1419_v42 }
 0x253   : > { %v531_v34 = vmul.f32 %v966_v20, %v1423_v43 }
 0x254   : > { %v757_v35 = vpack.c.bf16 %v529_v33, %v528_v21 }
 0x255   : > { %v762_v36 = vpack.c.bf16 %v531_v34, %v530_v31 }
 0x256   : > { %769 = vst [vmem:[%s1256_s19 + $0x30] sm:$0xff] %v757_v35  }
 0x257   : > { %770 = vst [vmem:[%s1256_s19 + $0x38] sm:$0xff] %v762_v36  }
 0x258 PF: > { %s723_s12 = sshll.u32 %s1107_s13, 6  ;;  %s577_s3 = sshll.u32 %s1256_s19, 4  ;;  %s578_s3 = int_to_ptr.vmem [resolvable:$true] %s577_s3 }
 0x259   : > { %s576_s30 = scalar_lea.hbm %s1506_s1, %s723_s12  ;;  %s565_s26 = scalar_lea.sflag [#allocation5], %s149_s23 }
 0x25a   : > { %s579_s22 = sshll.u32 %s576_s30, 4  ;;  %s1017_s13 = scalar_lea.hbm %s1506_s1, 128  ;;  %s580_s22 = int_to_ptr.hbm [resolvable:$true] %s579_s22 }
 0x25b   : > { %s1011_s24 = sshra.s32 %s580_s22, 4  ;;  %s1012_s24 = int_to_ptr.hbm [resolvable:$true] %s1011_s24 }
 0x25c   : > { %s1013_s21 = scalar_lea.hbm %s1012_s24, 64  ;;  %p1018_p13 = scmp.lt.s32.totalorder %s1012_s24, %s1506_s1 }
 0x25d   : > { %p1014_p9 = scmp.ne.s32.totalorder %s1012_s24, %s1013_s21  ;;  %p1019_p0 = scmp.lt.s32.totalorder %s1017_s13, %s1013_s21 }
 0x25f   : > { %p1015_p10 = pnand %p1014_p9, %p1219_p12  ;;  %p1020_p1 = por %p1019_p0, %p1018_p13 }
 0x261   : > { %p1016_p11 = pneg %p1015_p10 }
 0x263   : > { %p1021_p4 = pnand %p1020_p1, %p1016_p11 }
 0x265   : > { %1024 = shalt.err (!%p1021_p4)
}
 0x266   : > { %s1125_s9 = smov 64   ;;  %s1126_s17 = smov 4  }
 0x267   : > { %797 = dma.vmem_to_hbm [thread:$0]  (%p1219_p12), %s578_s3, 1024, %s580_s22, %s565_s26, %s1125_s9, %s1125_s9, %s1126_s17  }
 0x268 PF: > { %p808_p5 = scmp.ge.s32.totalorder %s1119_s16, 2  ;;  %s594_s23 = sand.u32 1, %s1079_s6  }
 0x269   : > { %s595_s11 = scalar_lea.sflag [#allocation5], %s594_s23 }
 0x26a   : > { %p804_p6 = pnand %p808_p5, %p1232_p2 }
 0x26c   : > { %p805_p8 = pneg %p804_p6 }
 0x26e   : > { %1074 = dma.done.wait (%p805_p8), %s595_s11, 1024  }
 0x26f   : > { %1076 = vsyncadd (%p805_p8), %s595_s11, 4294966272  ;;  %s17_s16 = sadd.s32 1, %s1119_s16   ;;  %s1518_s28 = sld [smem:[#allocation9_spill]] }
 0x270   : > { %p14_p3 = scmp.ge.s32.totalorder %s17_s16, 6   ;;  %s1519_s11 = sld [smem:[#allocation12_spill]] }
 0x271   : > { %s1520_s19 = sld [smem:[#allocation10_spill]]  ;;  %s1522_s6 = smov %s1083_s7 }
 0x272   : > { %s1521_s20 = sld [smem:[#allocation11_spill]]  ;;  %s1523_s7 = smov %s1087_s8 }
 0x273   : > { %s1524_s8 = smov %s1224_s29  ;;  %s1525_s9 = smov %s1095_s10 }
 0x274   : > { %s1527_s12 = smov %s1111_s14  ;;  %s1528_s13 = smov %s1115_s15 }
 0x275   : > { %s1526_s10 = smov %s1518_s28  ;;  %16 = sbr.rel (!%p14_p3) target bundleno = 9 (0x9), region = 77 }
 0x277   : > { %s1529_s14 = smov %s1520_s19 }
 0x278   : > { %s1530_s15 = smov %s1521_s20 }
 0x27a   :  { %601 = vsyncpa [#allocation4], 1 }
 0x27b   :  { %603 = vsyncpa [#allocation4 + $0x1], 1 }
 0x27c   :  { %604 = vsyncpa [#allocation5], 1 }
 0x27d   :  { %606 = vsyncpa [#allocation5 + $0x1], 1 }

</bundles_post_ra>
